<compile_context>
chip_gen: v7x
topology: tpu7x:2x2x1
jax: 0.10.0
libtpu: 0.0.40
codegen_flags: <defaults>
</compile_context>

<pallas_src>
import functools
import math

import jax
import jax.numpy as jnp
from jax.experimental import pallas as pl
from jax.experimental.pallas import tpu as pltpu

HIDDEN_PAD = 128       # padded lane width for the hidden layers (real 32/64/128)
TB_MAX = 4096          # max rows per batch tile (still only a few MiB of live VMEM)
SPLIT_MIN_ROWS = 1024  # once batch >= this, force >= 2 tiles (dual-TC on v7x)


def _round_up(n, m):
    return ((n + m - 1) // m) * m


def _choose_tb(batch, bytes_per_row):
    """Pick a 16-row-aligned batch tile.

    Big tiles amortize the ~0.35us per-grid-step overhead (v5e/v6e); for large
    batches we force >= 2 tiles so the "parallel" batch axis can shard across
    both v7x TensorCores. A conservative 24 MiB budget keeps the streamed
    x/out double-buffers inside the default scoped VMEM on every generation.
    """
    budget = 24 * 1024 * 1024
    cap = max(16, (budget // max(bytes_per_row, 1)) // 16 * 16)
    tb_max = min(TB_MAX, cap)
    n_tiles = max(1, -(-batch // tb_max))
    if batch >= SPLIT_MIN_ROWS and n_tiles == 1:
        n_tiles = 2
    return min(tb_max, _round_up(-(-batch // n_tiles), 16))


def _mlp_kernel(x_ref, w1_ref, b1_ref, w2_ref, b2_ref, w3_ref, b3_ref,
                wl_ref, bl_ref, out_ref):
    """One batch tile of the 4-layer MLP.

    x_ref  : (TB, num_inputs)        f32   streamed batch tile (cast to bf16 here)
    wN_ref : (in_pad, 128/out_pad)   bf16  VMEM-resident, lane-padded weights
    bN_ref : (1, 128/out_pad)        f32   lane-padded biases
    out_ref: (TB, out_pad)           bf16  f32-accumulated, bf16 at the store
    """
    h = x_ref[...].astype(jnp.bfloat16)
    h = jnp.dot(h, w1_ref[...], preferred_element_type=jnp.float32) + b1_ref[...]
    h = jnp.maximum(h.astype(jnp.bfloat16), 0.0)
    h = jnp.dot(h, w2_ref[...], preferred_element_type=jnp.float32) + b2_ref[...]
    h = jnp.maximum(h.astype(jnp.bfloat16), 0.0)
    h = jnp.dot(h, w3_ref[...], preferred_element_type=jnp.float32) + b3_ref[...]
    h = jnp.maximum(h.astype(jnp.bfloat16), 0.0)
    out = jnp.dot(h, wl_ref[...], preferred_element_type=jnp.float32) + bl_ref[...]
    out_ref[...] = out.astype(out_ref.dtype)


def _mlp_pallas(x, w1, b1, w2, b2, w3, b3, wl, bl):
    """Run the MLP kernel over batch tiles; returns padded bf16 (batch_pad, out_pad)."""
    batch, num_inputs = x.shape
    out_pad = wl.shape[1]

    bytes_per_row = 2 * num_inputs * 4 + 2 * out_pad * 2  # double-buffered x + out
    tb = _choose_tb(batch, bytes_per_row)
    padded_batch = _round_up(batch, tb)
    xp = x if padded_batch == batch else jnp.pad(x, ((0, padded_batch - batch), (0, 0)))

    const = lambda i: (0, 0)
    return pl.pallas_call(
        _mlp_kernel,
        out_shape=jax.ShapeDtypeStruct((padded_batch, out_pad), jnp.bfloat16),
        grid_spec=pltpu.PrefetchScalarGridSpec(
            num_scalar_prefetch=0,
            grid=(padded_batch // tb,),
            in_specs=[
                pl.BlockSpec((tb, num_inputs), lambda i: (i, 0)),  # streamed f32 x tile
                pl.BlockSpec(w1.shape, const), pl.BlockSpec(b1.shape, const),
                pl.BlockSpec(w2.shape, const), pl.BlockSpec(b2.shape, const),
                pl.BlockSpec(w3.shape, const), pl.BlockSpec(b3.shape, const),
                pl.BlockSpec(wl.shape, const), pl.BlockSpec(bl.shape, const),
            ],
            out_specs=pl.BlockSpec((tb, out_pad), lambda i: (i, 0)),
        ),
        compiler_params=pltpu.CompilerParams(
            dimension_semantics=("parallel",)),
    )(xp, w1, b1, w2, b2, w3, b3, wl, bl)


@functools.partial(jax.jit, static_argnames=("num_actions", "num_quants", "out_dtype"))
def qrdqn_forward(x, packed, *, num_actions, num_quants, out_dtype=jnp.float32):
    """Pallas-backed QRDQN.forward -> (batch, num_actions, num_quants)."""
    batch = x.shape[0]
    out_dim = num_actions * num_quants
    flat = _mlp_pallas(x, packed["w1"], packed["b1"], packed["w2"], packed["b2"],
                       packed["w3"], packed["b3"], packed["w4"], packed["b4"])
    if flat.shape != (batch, out_dim):
        flat = flat[:batch, :out_dim]
    return flat.astype(out_dtype).reshape(batch, num_actions, num_quants)


@functools.partial(jax.jit, static_argnames=("num_actions", "out_dtype"))
def qrdqn_q_values(x, packed, *, num_actions, out_dtype=jnp.float32):
    """QRDQN.q_values: mean over quantiles, fused into the kernel via a folded head."""
    batch = x.shape[0]
    flat = _mlp_pallas(x, packed["w1"], packed["b1"], packed["w2"], packed["b2"],
                       packed["w3"], packed["b3"], packed["wq"], packed["bq"])
    if flat.shape != (batch, num_actions):
        flat = flat[:batch, :num_actions]
    return flat.astype(out_dtype)


def init_qrdqn_params(key, num_inputs, num_actions, num_quants):
    """PyTorch-style init U(-1/sqrt(fan_in), 1/sqrt(fan_in)); raw f32, (in, out) layout."""
    dims = [num_inputs, 32, 64, 128, num_actions * num_quants]
    params = []
    for i in range(len(dims) - 1):
        fan_in, fan_out = dims[i], dims[i + 1]
        key, kw, kb = jax.random.split(key, 3)
        bound = 1.0 / math.sqrt(fan_in)
        w = jax.random.uniform(kw, (fan_in, fan_out), jnp.float32, -bound, bound)
        b = jax.random.uniform(kb, (fan_out,), jnp.float32, -bound, bound)
        params.append((w, b))
    return params


def pack_qrdqn_params(params, num_actions, num_quants):
    """Zero-pad lane dims to 128, cast weights to bf16, and build the folded q-head."""
    (w1, b1), (w2, b2), (w3, b3), (w4, b4) = params

    def pad_w(w, rows, cols):
        w = jnp.pad(w, ((0, rows - w.shape[0]), (0, cols - w.shape[1])))
        return w.astype(jnp.bfloat16)

    def pad_b(b, cols):
        return jnp.pad(b, (0, cols - b.shape[0])).astype(jnp.float32)[None, :]

    out_dim = num_actions * num_quants
    out_pad = _round_up(out_dim, 128)
    act_pad = _round_up(num_actions, 128)

    # Fold mean-over-quantiles into a tiny extra head:
    #   mean_q(h @ W4 + b4) == h @ (W4 @ M) + b4 @ M
    mean_mat = jnp.repeat(jnp.eye(num_actions, dtype=jnp.float32),
                          num_quants, axis=0) / num_quants
    wq = w4 @ mean_mat
    bq = b4 @ mean_mat

    return {
        "w1": pad_w(w1, w1.shape[0], HIDDEN_PAD), "b1": pad_b(b1, HIDDEN_PAD),
        "w2": pad_w(w2, HIDDEN_PAD, HIDDEN_PAD),  "b2": pad_b(b2, HIDDEN_PAD),
        "w3": pad_w(w3, HIDDEN_PAD, HIDDEN_PAD),  "b3": pad_b(b3, HIDDEN_PAD),
        "w4": pad_w(w4, HIDDEN_PAD, out_pad),     "b4": pad_b(b4, out_pad),
        "wq": pad_w(wq, HIDDEN_PAD, act_pad),     "bq": pad_b(bq, act_pad),
    }


def _mlp_ref(x, layers):
    """Plain-JAX reference mirroring the kernel numerics:
    bf16 inputs/weights, f32 accumulation, bf16 ReLU, bf16 final store."""
    h = x.astype(jnp.bfloat16)
    n = len(layers)
    for i, (w, b) in enumerate(layers):
        h = jnp.dot(h, w.astype(jnp.bfloat16), preferred_element_type=jnp.float32) + b
        if i < n - 1:
            h = jnp.maximum(h.astype(jnp.bfloat16), 0.0)
    return h.astype(jnp.bfloat16).astype(jnp.float32)


def qrdqn_forward_ref(x, params):
    return _mlp_ref(x, params)


def qrdqn_q_values_ref(x, params, num_actions, num_quants):
    (w1, b1), (w2, b2), (w3, b3), (w4, b4) = params
    mean_mat = jnp.repeat(jnp.eye(num_actions, dtype=jnp.float32),
                          num_quants, axis=0) / num_quants
    return _mlp_ref(x, [(w1, b1), (w2, b2), (w3, b3), (w4 @ mean_mat, b4 @ mean_mat)])


if __name__ == "__main__":
    # Small shapes consistent with the module's forward pass.
    num_inputs, num_actions, num_quants = 8, 4, 8

    key = jax.random.PRNGKey(0)
    kparams, kx1, kx2 = jax.random.split(key, 3)

    params = init_qrdqn_params(kparams, num_inputs, num_actions, num_quants)
    packed = pack_qrdqn_params(params, num_actions, num_quants)

    # forward(): batch=2
    x = jax.random.normal(kx1, (2, num_inputs), jnp.float32)
    out = jax.block_until_ready(
        qrdqn_forward(x, packed, num_actions=num_actions, num_quants=num_quants))
    assert out.shape == (2, num_actions, num_quants)
    ref = qrdqn_forward_ref(x, params).reshape(out.shape)
    assert jnp.allclose(out, ref, atol=5e-3, rtol=5e-3), float(jnp.max(jnp.abs(out - ref)))

    # q_values(): fused mean-over-quantiles head.
    q = jax.block_until_ready(qrdqn_q_values(x, packed, num_actions=num_actions))
    q_ref = qrdqn_q_values_ref(x, params, num_actions, num_quants)
    assert q.shape == (2, num_actions)
    assert jnp.allclose(q, q_ref, atol=5e-3, rtol=5e-3), float(jnp.max(jnp.abs(q - q_ref)))
    assert jnp.allclose(q, out.mean(-1), atol=2e-2, rtol=2e-2)

    # Larger, non-aligned batch exercises batch padding + the >=2-tile parallel grid.
    xb = jax.random.normal(kx2, (1040, num_inputs), jnp.float32)
    outb = jax.block_until_ready(
        qrdqn_forward(xb, packed, num_actions=num_actions, num_quants=num_quants))
    refb = qrdqn_forward_ref(xb, params).reshape(outb.shape)
    assert jnp.allclose(outb, refb, atol=5e-3, rtol=5e-3), float(jnp.max(jnp.abs(outb - refb)))

    # TODO(synk): QRDQN.act's epsilon-greedy branch uses host-side Python RNG and
    # control flow; it stays outside the kernel (argmax over qrdqn_q_values output).
    print("KERNEL_OK")
</pallas_src>

<mosaic_0001>
module attributes {stable_mosaic.version = 11 : i64} {
  func.func @_mlp_kernel(%arg0: i32, %arg1: memref<16x8xf32, #tpu.memory_space<vmem>>, %arg2: memref<8x128xbf16, #tpu.memory_space<vmem>>, %arg3: memref<1x128xf32, #tpu.memory_space<vmem>>, %arg4: memref<128x128xbf16, #tpu.memory_space<vmem>>, %arg5: memref<1x128xf32, #tpu.memory_space<vmem>>, %arg6: memref<128x128xbf16, #tpu.memory_space<vmem>>, %arg7: memref<1x128xf32, #tpu.memory_space<vmem>>, %arg8: memref<128x128xbf16, #tpu.memory_space<vmem>>, %arg9: memref<1x128xf32, #tpu.memory_space<vmem>>, %arg10: memref<16x128xbf16, #tpu.memory_space<vmem>>) attributes {dimension_semantics = [#tpu.dimension_semantics<parallel>], iteration_bounds = array<i64: 1>, scalar_prefetch = 0 : i64, scratch_operands = 0 : i64, tpu.core_type = #tpu.core_type<tc>, window_params = [{transform_indices = @transform_0, window_bounds = array<i64: 16, 8>}, {pipeline_mode = #tpu.pipeline_mode<synchronous>, transform_indices = @transform_1, window_bounds = array<i64: 8, 128>}, {pipeline_mode = #tpu.pipeline_mode<synchronous>, transform_indices = @transform_2, window_bounds = array<i64: 1, 128>}, {pipeline_mode = #tpu.pipeline_mode<synchronous>, transform_indices = @transform_3, window_bounds = array<i64: 128, 128>}, {pipeline_mode = #tpu.pipeline_mode<synchronous>, transform_indices = @transform_4, window_bounds = array<i64: 1, 128>}, {pipeline_mode = #tpu.pipeline_mode<synchronous>, transform_indices = @transform_5, window_bounds = array<i64: 128, 128>}, {pipeline_mode = #tpu.pipeline_mode<synchronous>, transform_indices = @transform_6, window_bounds = array<i64: 1, 128>}, {pipeline_mode = #tpu.pipeline_mode<synchronous>, transform_indices = @transform_7, window_bounds = array<i64: 128, 128>}, {pipeline_mode = #tpu.pipeline_mode<synchronous>, transform_indices = @transform_8, window_bounds = array<i64: 1, 128>}, {transform_indices = @transform_9, window_bounds = array<i64: 16, 128>}]} {
    %c0 = arith.constant 0 : index
    %c0_0 = arith.constant 0 : index
    %0 = vector.load %arg1[%c0, %c0_0] : memref<16x8xf32, #tpu.memory_space<vmem>>, vector<16x8xf32>
    %1 = arith.truncf %0 : vector<16x8xf32> to vector<16x8xbf16>
    %c0_1 = arith.constant 0 : index
    %c0_2 = arith.constant 0 : index
    %2 = vector.load %arg2[%c0_1, %c0_2] : memref<8x128xbf16, #tpu.memory_space<vmem>>, vector<8x128xbf16>
    %cst = arith.constant dense<0.000000e+00> : vector<16x128xf32>
    %3 = tpu.matmul %1, %2, %cst {dimension_numbers = #tpu.dot_dimension_numbers<[1], [0], [0], [1], [0, 0, 1, 1], [], []>} : vector<16x8xbf16>, vector<8x128xbf16>, vector<16x128xf32> -> vector<16x128xf32>
    %c0_3 = arith.constant 0 : index
    %c0_4 = arith.constant 0 : index
    %4 = vector.load %arg3[%c0_3, %c0_4] : memref<1x128xf32, #tpu.memory_space<vmem>>, vector<1x128xf32>
    %5 = vector.broadcast %4 : vector<1x128xf32> to vector<16x128xf32>
    %6 = arith.addf %3, %5 : vector<16x128xf32>
    %7 = arith.truncf %6 : vector<16x128xf32> to vector<16x128xbf16>
    %cst_5 = arith.constant 0.000000e+00 : bf16
    %8 = vector.broadcast %cst_5 : bf16 to vector<16x128xbf16>
    %9 = arith.maximumf %7, %8 : vector<16x128xbf16>
    %c0_6 = arith.constant 0 : index
    %c0_7 = arith.constant 0 : index
    %10 = vector.load %arg4[%c0_6, %c0_7] : memref<128x128xbf16, #tpu.memory_space<vmem>>, vector<128x128xbf16>
    %cst_8 = arith.constant dense<0.000000e+00> : vector<16x128xf32>
    %11 = tpu.matmul %9, %10, %cst_8 {dimension_numbers = #tpu.dot_dimension_numbers<[1], [0], [0], [1], [0, 0, 1, 1], [], []>} : vector<16x128xbf16>, vector<128x128xbf16>, vector<16x128xf32> -> vector<16x128xf32>
    %c0_9 = arith.constant 0 : index
    %c0_10 = arith.constant 0 : index
    %12 = vector.load %arg5[%c0_9, %c0_10] : memref<1x128xf32, #tpu.memory_space<vmem>>, vector<1x128xf32>
    %13 = vector.broadcast %12 : vector<1x128xf32> to vector<16x128xf32>
    %14 = arith.addf %11, %13 : vector<16x128xf32>
    %15 = arith.truncf %14 : vector<16x128xf32> to vector<16x128xbf16>
    %cst_11 = arith.constant 0.000000e+00 : bf16
    %16 = vector.broadcast %cst_11 : bf16 to vector<16x128xbf16>
    %17 = arith.maximumf %15, %16 : vector<16x128xbf16>
    %c0_12 = arith.constant 0 : index
    %c0_13 = arith.constant 0 : index
    %18 = vector.load %arg6[%c0_12, %c0_13] : memref<128x128xbf16, #tpu.memory_space<vmem>>, vector<128x128xbf16>
    %cst_14 = arith.constant dense<0.000000e+00> : vector<16x128xf32>
    %19 = tpu.matmul %17, %18, %cst_14 {dimension_numbers = #tpu.dot_dimension_numbers<[1], [0], [0], [1], [0, 0, 1, 1], [], []>} : vector<16x128xbf16>, vector<128x128xbf16>, vector<16x128xf32> -> vector<16x128xf32>
    %c0_15 = arith.constant 0 : index
    %c0_16 = arith.constant 0 : index
    %20 = vector.load %arg7[%c0_15, %c0_16] : memref<1x128xf32, #tpu.memory_space<vmem>>, vector<1x128xf32>
    %21 = vector.broadcast %20 : vector<1x128xf32> to vector<16x128xf32>
    %22 = arith.addf %19, %21 : vector<16x128xf32>
    %23 = arith.truncf %22 : vector<16x128xf32> to vector<16x128xbf16>
    %cst_17 = arith.constant 0.000000e+00 : bf16
    %24 = vector.broadcast %cst_17 : bf16 to vector<16x128xbf16>
    %25 = arith.maximumf %23, %24 : vector<16x128xbf16>
    %c0_18 = arith.constant 0 : index
    %c0_19 = arith.constant 0 : index
    %26 = vector.load %arg8[%c0_18, %c0_19] : memref<128x128xbf16, #tpu.memory_space<vmem>>, vector<128x128xbf16>
    %cst_20 = arith.constant dense<0.000000e+00> : vector<16x128xf32>
    %27 = tpu.matmul %25, %26, %cst_20 {dimension_numbers = #tpu.dot_dimension_numbers<[1], [0], [0], [1], [0, 0, 1, 1], [], []>} : vector<16x128xbf16>, vector<128x128xbf16>, vector<16x128xf32> -> vector<16x128xf32>
    %c0_21 = arith.constant 0 : index
    %c0_22 = arith.constant 0 : index
    %28 = vector.load %arg9[%c0_21, %c0_22] : memref<1x128xf32, #tpu.memory_space<vmem>>, vector<1x128xf32>
    %29 = vector.broadcast %28 : vector<1x128xf32> to vector<16x128xf32>
    %30 = arith.addf %27, %29 : vector<16x128xf32>
    %31 = arith.truncf %30 : vector<16x128xf32> to vector<16x128xbf16>
    %c0_23 = arith.constant 0 : index
    %c0_24 = arith.constant 0 : index
    %32 = vector.load %arg10[%c0_23, %c0_24] : memref<16x128xbf16, #tpu.memory_space<vmem>>, vector<16x128xbf16>
    tpu.vector_store %arg10[%c0_23, %c0_24], %31 {strides = array<i32>} : memref<16x128xbf16, #tpu.memory_space<vmem>>, vector<16x128xbf16>,
    return
  }
  func.func @transform_0(%arg0: i32) -> (i32, i32) {
    %c0_i32 = arith.constant 0 : i32
    %c0_i32_0 = arith.constant 0 : i32
    return %arg0, %c0_i32 : i32, i32
  }
  func.func @transform_1(%arg0: i32) -> (i32, i32) {
    %c0_i32 = arith.constant 0 : i32
    %c0_i32_0 = arith.constant 0 : i32
    %c0_i32_1 = arith.constant 0 : i32
    return %c0_i32, %c0_i32_0 : i32, i32
  }
  func.func @transform_2(%arg0: i32) -> (i32, i32) {
    %c0_i32 = arith.constant 0 : i32
    %c0_i32_0 = arith.constant 0 : i32
    %c0_i32_1 = arith.constant 0 : i32
    return %c0_i32, %c0_i32_0 : i32, i32
  }
  func.func @transform_3(%arg0: i32) -> (i32, i32) {
    %c0_i32 = arith.constant 0 : i32
    %c0_i32_0 = arith.constant 0 : i32
    %c0_i32_1 = arith.constant 0 : i32
    return %c0_i32, %c0_i32_0 : i32, i32
  }
  func.func @transform_4(%arg0: i32) -> (i32, i32) {
    %c0_i32 = arith.constant 0 : i32
    %c0_i32_0 = arith.constant 0 : i32
    %c0_i32_1 = arith.constant 0 : i32
    return %c0_i32, %c0_i32_0 : i32, i32
  }
  func.func @transform_5(%arg0: i32) -> (i32, i32) {
    %c0_i32 = arith.constant 0 : i32
    %c0_i32_0 = arith.constant 0 : i32
    %c0_i32_1 = arith.constant 0 : i32
    return %c0_i32, %c0_i32_0 : i32, i32
  }
  func.func @transform_6(%arg0: i32) -> (i32, i32) {
    %c0_i32 = arith.constant 0 : i32
    %c0_i32_0 = arith.constant 0 : i32
    %c0_i32_1 = arith.constant 0 : i32
    return %c0_i32, %c0_i32_0 : i32, i32
  }
  func.func @transform_7(%arg0: i32) -> (i32, i32) {
    %c0_i32 = arith.constant 0 : i32
    %c0_i32_0 = arith.constant 0 : i32
    %c0_i32_1 = arith.constant 0 : i32
    return %c0_i32, %c0_i32_0 : i32, i32
  }
  func.func @transform_8(%arg0: i32) -> (i32, i32) {
    %c0_i32 = arith.constant 0 : i32
    %c0_i32_0 = arith.constant 0 : i32
    %c0_i32_1 = arith.constant 0 : i32
    return %c0_i32, %c0_i32_0 : i32, i32
  }
  func.func @transform_9(%arg0: i32) -> (i32, i32) {
    %c0_i32 = arith.constant 0 : i32
    %c0_i32_0 = arith.constant 0 : i32
    return %arg0, %c0_i32 : i32, i32
  }
}

</mosaic_0001>

<bundles_post_ra>
// kernel: qrdqn_forward.1
= control target key start
LH: loop header
LB: loop body
LE: loop exit
PB: predicated region body
PF: predicated region fallthrough
CT: control target
= control target key end

     0   :  { %14 = vsyncpa [#allocation3], 0  ;;  %s894_s0 = inlined_call_operand.vmem [shape: f32[16,8], index: 0, kind: input, shape index: {}]   ;;  %s895_s1 = inlined_call_operand.vmem [shape: bf16[8,128], index: 1, kind: input, shape index: {}]   ;;  %s896_s2 = inlined_call_operand.vmem [shape: f32[1,128], index: 2, kind: input, shape index: {}]   ;;  %s897_s3 = inlined_call_operand.hbm [shape: bf16[128,128], index: 3, kind: input, shape index: {}]   ;;  %s898_s4 = inlined_call_operand.vmem [shape: f32[1,128], index: 4, kind: input, shape index: {}]   ;;  %s899_s5 = inlined_call_operand.hbm [shape: bf16[128,128], index: 5, kind: input, shape index: {}]   ;;  %s900_s6 = inlined_call_operand.vmem [shape: f32[1,128], index: 6, kind: input, shape index: {}]   ;;  %s901_s7 = inlined_call_operand.hbm [shape: bf16[128,128], index: 7, kind: input, shape index: {}]   ;;  %s902_s8 = inlined_call_operand.vmem [shape: f32[1,128], index: 8, kind: input, shape index: {}]   ;;  %s903_s9 = inlined_call_operand.vmem [shape: bf16[16,128], index: 9, kind: output, shape index: {}]  }
   0x1   :  { %15 = vsyncpa [#allocation5], 0  ;;  %s727_s30 = smov [#allocation4]   ;;  %s728_s11 = smov [#allocation2]  }
   0x2   :  { %s41_s10 = sshll.u32 %s727_s30, 4  ;;  %s27_s12 = sshll.u32 %s728_s11, 4  ;;  %s42_s10 = int_to_ptr.vmem [resolvable:$true] %s41_s10  ;;  %s785_s12 = int_to_ptr.vmem [resolvable:$true] %s27_s12 }
   0x3   :  { %s657_s15 = scalar_lea.hbm %s899_s5, 1024 }
   0x4   :  { %p658_p0 = scmp.ne.s32.totalorder %s899_s5, %s657_s15  ;;  %p661_p1 = scmp.lt.u32.totalorder %s657_s15, %s899_s5 }
   0x6   :  { %p663_p2 = pnand %p661_p1, %p658_p0 }
   0x8   :  { %666 = shalt.err (!%p663_p2)
}
   0x9   :  { %s667_s20 = scalar_lea.vmem %s42_s10, 1024  ;;  %p672_p4 = scmp.lt.s32.totalorder %s42_s10, %s42_s10 }
   0xa   :  { %p668_p3 = scmp.ne.s32.totalorder %s42_s10, %s667_s20  ;;  %p673_p5 = scmp.lt.s32.totalorder %s667_s20, %s667_s20 }
   0xc   :  { %p674_p6 = por %p673_p5, %p672_p4 }
   0xe   :  { %p675_p7 = pnand %p674_p6, %p668_p3 }
  0x10   :  { %678 = shalt.err (!%p675_p7)
}
  0x11   :  { %s729_s21 = smov 64   ;;  %s730_s22 = smov 4  }
  0x12   :  { %47 = dma.hbm_to_vmem [thread:$0]  %s899_s5, 1024, %s42_s10, [#allocation5], %s729_s21, %s729_s21, %s730_s22  }
  0x13   :  { %s679_s27 = scalar_lea.hbm %s897_s3, 1024 }
  0x14   :  { %p680_p8 = scmp.ne.s32.totalorder %s897_s3, %s679_s27  ;;  %p683_p9 = scmp.lt.u32.totalorder %s679_s27, %s897_s3 }
  0x16   :  { %p685_p10 = pnand %p683_p9, %p680_p8 }
  0x18   :  { %688 = shalt.err (!%p685_p10)
}
  0x19   :  { %s689_s13 = scalar_lea.vmem %s785_s12, 1024  ;;  %p694_p12 = scmp.lt.s32.totalorder %s785_s12, %s785_s12 }
  0x1a   :  { %p690_p11 = scmp.ne.s32.totalorder %s785_s12, %s689_s13  ;;  %p695_p13 = scmp.lt.s32.totalorder %s689_s13, %s689_s13 }
  0x1c   :  { %p696_p0 = por %p695_p13, %p694_p12 }
  0x1e   :  { %p697_p1 = pnand %p696_p0, %p690_p11 }
  0x20   :  { %700 = shalt.err (!%p697_p1)
}
  0x21   :  { %33 = dma.hbm_to_vmem [thread:$0]  %s897_s3, 1024, %s785_s12, [#allocation3], %s729_s21, %s729_s21, %s730_s22  }
  0x22   :  { %s731_s14 = smov [#allocation6]   ;;  %s701_s18 = scalar_lea.hbm %s901_s7, 1024 }
  0x23   :  { %s55_s15 = sshll.u32 %s731_s14, 4  ;;  %p702_p2 = scmp.ne.s32.totalorder %s901_s7, %s701_s18  ;;  %s56_s15 = int_to_ptr.vmem [resolvable:$true] %s55_s15 }
  0x24   :  { %p705_p3 = scmp.lt.u32.totalorder %s701_s18, %s901_s7 }
  0x26   :  { %p707_p4 = pnand %p705_p3, %p702_p2 }
  0x28   :  { %710 = shalt.err (!%p707_p4)
}
  0x29   :  { %s711_s25 = scalar_lea.vmem %s56_s15, 1024  ;;  %p716_p6 = scmp.lt.s32.totalorder %s56_s15, %s56_s15 }
  0x2a   :  { %p712_p5 = scmp.ne.s32.totalorder %s56_s15, %s711_s25  ;;  %p717_p7 = scmp.lt.s32.totalorder %s711_s25, %s711_s25 }
  0x2c   :  { %p718_p8 = por %p717_p7, %p716_p6 }
  0x2e   :  { %p719_p9 = pnand %p718_p8, %p712_p5 }
  0x30   :  { %722 = shalt.err (!%p719_p9)
}
  0x31   :  { %61 = dma.hbm_to_vmem [thread:$0]  %s901_s7, 1024, %s56_s15, [#allocation5], %s729_s21, %s729_s21, %s730_s22  }
  0x32   :  { %723 = dma.done.wait [#allocation3], 1024  }
  0x33   :  { %724 = vsyncadd [#allocation3], 4294966272 }
  0x34   :  { %725 = dma.done.wait [#allocation5], 2048  }
  0x35   :  { %726 = vsyncadd [#allocation5], 4294965248  ;;  %v732_v0 = vmov 0.0   ;;  %vm733_vm0 = vmmov 0   ;;  %vm89_vm1 = vcmask 1043456   ;;  %v74_v2 = vld [vmem:[%s894_s0] sm:$0xff] }
  0x36   :  { %559 = vmatprep.subr.bf16.mxu0 %v732_v0  ;;  %561 = vmatprep.mubr.msk.bf16.mxu0 %vm733_vm0, %v732_v0  ;;  %v77_v1 = vld [vmem:[%s895_s1] sm:$0xf]  ;;  %v75_v3 = vld [vmem:[%s894_s0 + $0x8] sm:$0xff]  ;;  %vm85_vm2 = vcmask 64512   ;;  %v635_v8 = vld [vmem:[#allocation2 + $0x10] sm:$0xff]   ;;  %v734_v28 = vmov 0  }
  0x37   :  { %565 = vmatprep.subr.bf16.mxu1 %v732_v0  ;;  %581 = vmatprep.mubr.msk.bf16.mxu1 %vm733_vm0, %v732_v0  ;;  %v91_v4 = vsel %vm89_vm1, %v77_v1, 0  ;;  %v76_v5 = vpack.c.bf16 %v75_v3, %v74_v2  ;;  %v633_v6 = vld [vmem:[#allocation2] sm:$0xff]   ;;  %v634_v7 = vld [vmem:[#allocation2 + $0x8] sm:$0xff]   ;;  %v636_v9 = vld [vmem:[#allocation2 + $0x18] sm:$0xff]  }
  0x38   :  { %560 = vmatpush3.bf16.msra.mxu0 %v91_v4  ;;  %566 = vmatpush3.bf16.msra.mxu1 %v633_v6  ;;  %v637_v10 = vld [vmem:[#allocation2 + $0x20] sm:$0xff]   ;;  %v638_v11 = vld [vmem:[#allocation2 + $0x28] sm:$0xff]   ;;  %v639_v12 = vld [vmem:[#allocation2 + $0x30] sm:$0xff]  }
  0x39   :  { %585 = vmatprep.subr.bf16.mxu0 %v732_v0  ;;  %567 = vmatprep.subr.bf16.mxu1 %v732_v0  ;;  %v640_v13 = vld [vmem:[#allocation2 + $0x38] sm:$0xff]   ;;  %v641_v14 = vld [vmem:[#allocation4] sm:$0xff]   ;;  %v642_v15 = vld [vmem:[#allocation4 + $0x8] sm:$0xff]  }
  0x3a   :  { %v643_v16 = vld [vmem:[#allocation4 + $0x10] sm:$0xff]   ;;  %v644_v17 = vld [vmem:[#allocation4 + $0x18] sm:$0xff]   ;;  %v645_v18 = vld [vmem:[#allocation4 + $0x20] sm:$0xff]  }
  0x3b   :  { %562 = vmatmul.mubr.msk.bf16.vlgmr.msra.gmra.mrb[0].mxu0 %vm85_vm2, %v76_v5  ;;  %v646_v19 = vld [vmem:[#allocation4 + $0x28] sm:$0xff]   ;;  %v492_v20 = vld [vmem:[%s896_s2] ss:$0 sm:$0xff]  ;;  %v647_v30 = vld [vmem:[#allocation4 + $0x30] sm:$0xff]  }
  0x3c   :  { %601 = vmatprep.mubr.msk.bf16.mxu0 %vm733_vm0, %v732_v0  ;;  %568 = vmatpush3.bf16.msra.mxu1 %v634_v7  ;;  %v648_v31 = vld [vmem:[#allocation4 + $0x38] sm:$0xff]   ;;  %v649_v32 = vld [vmem:[#allocation6] sm:$0xff]   ;;  %v650_v33 = vld [vmem:[#allocation6 + $0x8] sm:$0xff]  }
  0x3d   :  { %569 = vmatprep.subr.bf16.mxu1 %v732_v0  ;;  %586 = vmatpush3.bf16.msra.mxu0 %v641_v14  ;;  %v651_v34 = vld [vmem:[#allocation6 + $0x10] sm:$0xff]   ;;  %v652_v35 = vld [vmem:[#allocation6 + $0x18] sm:$0xff]   ;;  %v653_v36 = vld [vmem:[#allocation6 + $0x20] sm:$0xff]  }
  0x3e   :  { %587 = vmatprep.subr.bf16.mxu0 %v732_v0  ;;  %v654_v37 = vld [vmem:[#allocation6 + $0x28] sm:$0xff]   ;;  %v494_v38 = vld [vmem:[%s898_s4] ss:$0 sm:$0xff]  ;;  %v655_v47 = vld [vmem:[#allocation6 + $0x30] sm:$0xff]  }
  0x3f   :  { %v656_v48 = vld [vmem:[#allocation6 + $0x38] sm:$0xff]   ;;  %v503_v49 = vld [vmem:[%s900_s6] ss:$0 sm:$0xff] }
  0x40   :  { %570 = vmatpush3.bf16.msra.mxu1 %v635_v8  ;;  %v512_v58 = vld [vmem:[%s902_s8] ss:$0 sm:$0xff] }
  0x41   :  { %571 = vmatprep.subr.bf16.mxu1 %v732_v0  ;;  %588 = vmatpush3.bf16.msra.mxu0 %v642_v15 }
  0x42   :  { %589 = vmatprep.subr.bf16.mxu0 %v732_v0 }
  0x44   :  { %572 = vmatpush3.bf16.msra.mxu1 %v636_v9 }
  0x45   :  { %573 = vmatprep.subr.bf16.mxu1 %v732_v0  ;;  %590 = vmatpush3.bf16.msra.mxu0 %v643_v16 }
  0x46   :  { %591 = vmatprep.subr.bf16.mxu0 %v732_v0 }
  0x48   :  { %574 = vmatpush3.bf16.msra.mxu1 %v637_v10 }
  0x49   :  { %575 = vmatprep.subr.bf16.mxu1 %v732_v0  ;;  %592 = vmatpush3.bf16.msra.mxu0 %v644_v17 }
  0x4a   :  { %593 = vmatprep.subr.bf16.mxu0 %v732_v0 }
  0x4c   :  { %576 = vmatpush3.bf16.msra.mxu1 %v638_v11 }
  0x4d   :  { %577 = vmatprep.subr.bf16.mxu1 %v732_v0  ;;  %594 = vmatpush3.bf16.msra.mxu0 %v645_v18 }
  0x4e   :  { %595 = vmatprep.subr.bf16.mxu0 %v732_v0 }
  0x50   :  { %578 = vmatpush3.bf16.msra.mxu1 %v639_v12 }
  0x51   :  { %579 = vmatprep.subr.bf16.mxu1 %v732_v0  ;;  %596 = vmatpush3.bf16.msra.mxu0 %v646_v19 }
  0x52   :  { %597 = vmatprep.subr.bf16.mxu0 %v732_v0 }
  0x54   :  { %580 = vmatpush3.bf16.msra.mxu1 %v640_v13 }
  0x55   :  { %605 = vmatprep.subr.bf16.mxu1 %v732_v0  ;;  %598 = vmatpush3.bf16.msra.mxu0 %v647_v30 }
  0x56   :  { %599 = vmatprep.subr.bf16.mxu0 %v732_v0 }
  0x59   :  { %600 = vmatpush3.bf16.msra.mxu0 %v648_v31 }
 0x10e   :  { %v127_v21 = vpop.f32.mrb[0].mxu0 }
 0x10f   :  { %v563_v22 = vpop.f32.mrb[1].mxu0  ;;  %v128_v24 = vadd.f32 %v492_v20, %v127_v21 }
 0x110   :  { %v130_v23 = vpop.f32.mrb[2].mxu0 }
 0x111   :  { %v131_v25 = vadd.f32 %v492_v20, %v130_v23  ;;  %v564_v26 = vpop.f32.mrb[3].mxu0 }
 0x113   :  { %v134_v27 = vpack.c.bf16 %v131_v25, %v128_v24 }
 0x115   :  { %v135_v29 = vmax.bf16 %v734_v28, %v134_v27 }
 0x117   :  { %582 = vmatmul.mubr.bf16.vlgmr.msra.gmra.mrb[0].mxu1 %v135_v29 }
 0x118   :  { %621 = vmatprep.mubr.msk.bf16.mxu1 %vm733_vm0, %v732_v0  ;;  %606 = vmatpush3.bf16.msra.mxu1 %v649_v32 }
 0x119   :  { %607 = vmatprep.subr.bf16.mxu1 %v732_v0 }
 0x11c   :  { %608 = vmatpush3.bf16.msra.mxu1 %v650_v33 }
 0x11d   :  { %609 = vmatprep.subr.bf16.mxu1 %v732_v0 }
 0x120   :  { %610 = vmatpush3.bf16.msra.mxu1 %v651_v34 }
 0x121   :  { %611 = vmatprep.subr.bf16.mxu1 %v732_v0 }
 0x124   :  { %612 = vmatpush3.bf16.msra.mxu1 %v652_v35 }
 0x125   :  { %613 = vmatprep.subr.bf16.mxu1 %v732_v0 }
 0x128   :  { %614 = vmatpush3.bf16.msra.mxu1 %v653_v36 }
 0x129   :  { %615 = vmatprep.subr.bf16.mxu1 %v732_v0 }
 0x12c   :  { %616 = vmatpush3.bf16.msra.mxu1 %v654_v37 }
 0x12d   :  { %617 = vmatprep.subr.bf16.mxu1 %v732_v0 }
 0x130   :  { %618 = vmatpush3.bf16.msra.mxu1 %v655_v47 }
 0x131   :  { %619 = vmatprep.subr.bf16.mxu1 %v732_v0 }
 0x134   :  { %620 = vmatpush3.bf16.msra.mxu1 %v656_v48 }
 0x1ea   :  { %v241_v39 = vpop.f32.mrb[0].mxu1 }
 0x1eb   :  { %v583_v40 = vpop.f32.mrb[1].mxu1  ;;  %v242_v42 = vadd.f32 %v494_v38, %v241_v39 }
 0x1ec   :  { %v244_v41 = vpop.f32.mrb[2].mxu1 }
 0x1ed   :  { %v245_v43 = vadd.f32 %v494_v38, %v244_v41  ;;  %v584_v44 = vpop.f32.mrb[3].mxu1 }
 0x1ef   :  { %v248_v45 = vpack.c.bf16 %v245_v43, %v242_v42 }
 0x1f1   :  { %v249_v46 = vmax.bf16 %v734_v28, %v248_v45 }
 0x1f3   :  { %602 = vmatmul.mubr.bf16.vlgmr.msra.gmra.mrb[4].mxu0 %v249_v46 }
 0x2c6   :  { %v355_v50 = vpop.f32.mrb[4].mxu0 }
 0x2c7   :  { %v603_v51 = vpop.f32.mrb[5].mxu0  ;;  %v356_v53 = vadd.f32 %v503_v49, %v355_v50 }
 0x2c8   :  { %v358_v52 = vpop.f32.mrb[6].mxu0 }
 0x2c9   :  { %v359_v54 = vadd.f32 %v503_v49, %v358_v52  ;;  %v604_v55 = vpop.f32.mrb[7].mxu0 }
 0x2cb   :  { %v362_v56 = vpack.c.bf16 %v359_v54, %v356_v53 }
 0x2cd   :  { %v363_v57 = vmax.bf16 %v734_v28, %v362_v56 }
 0x2cf   :  { %622 = vmatmul.mubr.bf16.vlgmr.msra.gmra.mrb[4].mxu1 %v363_v57 }
 0x3a2   :  { %v469_v59 = vpop.f32.mrb[4].mxu1 }
 0x3a3   :  { %v623_v60 = vpop.f32.mrb[5].mxu1  ;;  %v470_v62 = vadd.f32 %v512_v58, %v469_v59 }
 0x3a4   :  { %v472_v61 = vpop.f32.mrb[6].mxu1 }
 0x3a5   :  { %v473_v63 = vadd.f32 %v512_v58, %v472_v61  ;;  %v624_v0 = vpop.f32.mrb[7].mxu1 }
 0x3a7   :  { %v528_v1 = vpack.c.bf16 %v473_v63, %v470_v62 }
 0x3a9   :  { %529 = vst [vmem:[%s903_s9] sm:$0xff] %v528_v1  }
 0x3aa   :  { %490 = vsyncpa [#allocation3], 1 }
 0x3ab   :  { %491 = vsyncpa [#allocation5], 1 }

</bundles_post_ra>
